<compile_context>
chip_gen: v7x
topology: tpu7x:2x2x1
jax: 0.10.0
libtpu: 0.0.40
codegen_flags: <defaults>
</compile_context>

<pallas_src>
import math

import jax
import jax.numpy as jnp
from jax.experimental import pallas as pl
from jax.experimental.pallas import tpu as pltpu


def _round_up(x, m):
    return (x + m - 1) // m * m


def _make_fused_kernel(hidden, width, *, negative_slope=0.01, eps=1e-5):
    """nk == 1: whole residual block fused per row tile, no scratch.

    `hidden` is the true feature count used for the LayerNorm statistics;
    `width` is the (possibly padded) lane width of the tensors.  When the last
    row tile runs past `rows`, the out-of-bounds rows contain garbage, but all
    ops here are row-independent and OOB output writes are masked, so valid
    rows are never contaminated (do NOT add cross-row reductions here).
    """
    needs_mask = width != hidden
    inv_h = 1.0 / float(hidden)

    def kernel(x_ref, gamma_ref, beta_ref, w1_ref, b1_ref, w2_ref, b2_ref, o_ref):
        # ---- LayerNorm: f32 statistics over the true `hidden` features.
        x = x_ref[...].astype(jnp.float32)                       # (tm, width)
        mean = jnp.sum(x, axis=-1, keepdims=True) * inv_h
        xc = x - mean
        if needs_mask:
            lane = jax.lax.broadcasted_iota(jnp.int32, xc.shape, 1)
            xc = jnp.where(lane < hidden, xc, 0.0)
        var = jnp.sum(xc * xc, axis=-1, keepdims=True) * inv_h
        xn = xc * jax.lax.rsqrt(var + eps)
        xn = (xn * gamma_ref[...].astype(jnp.float32)
              + beta_ref[...].astype(jnp.float32))

        # ---- Linear1 -> LeakyReLU -> Linear2, bf16 MXU operands, f32 accum.
        h = jnp.dot(xn.astype(w1_ref.dtype), w1_ref[...],
                    preferred_element_type=jnp.float32)
        h = h + b1_ref[...].astype(jnp.float32)
        h = jnp.maximum(h, negative_slope * h)                   # LeakyReLU (slope < 1)
        y = jnp.dot(h.astype(w2_ref.dtype), w2_ref[...],
                    preferred_element_type=jnp.float32)
        y = y + b2_ref[...].astype(jnp.float32)

        # ---- residual add in f32, write final result directly (no acc pass).
        o_ref[...] = (x + y).astype(o_ref.dtype)

    return kernel


def _make_ktiled_kernel(hidden, width, *, negative_slope=0.01, eps=1e-5):
    """nk > 1: the second grid axis tiles the intermediate hidden dimension
    (Linear1 output / Linear2 input).  LayerNorm(x) is cached once per row
    tile in the compute dtype; a f32 VMEM accumulator carries the Linear2 sum.
    """
    needs_mask = width != hidden
    inv_h = 1.0 / float(hidden)

    def kernel(x_ref, gamma_ref, beta_ref, w1_ref, b1_ref, w2_ref, b2_ref,
               o_ref, xn_ref, acc_ref):
        k = pl.program_id(1)

        @pl.when(k == 0)
        def _():
            x = x_ref[...].astype(jnp.float32)                   # (tm, width)
            mean = jnp.sum(x, axis=-1, keepdims=True) * inv_h
            xc = x - mean
            if needs_mask:
                lane = jax.lax.broadcasted_iota(jnp.int32, xc.shape, 1)
                xc = jnp.where(lane < hidden, xc, 0.0)
            var = jnp.sum(xc * xc, axis=-1, keepdims=True) * inv_h
            xn = xc * jax.lax.rsqrt(var + eps)
            xn = (xn * gamma_ref[...].astype(jnp.float32)
                  + beta_ref[...].astype(jnp.float32))
            xn_ref[...] = xn.astype(xn_ref.dtype)
            acc_ref[...] = jnp.zeros_like(acc_ref)

        h = jnp.dot(xn_ref[...], w1_ref[...], preferred_element_type=jnp.float32)
        h = h + b1_ref[...].astype(jnp.float32)
        h = jnp.maximum(h, negative_slope * h)
        acc_ref[...] += jnp.dot(h.astype(w2_ref.dtype), w2_ref[...],
                                preferred_element_type=jnp.float32)

        @pl.when(k == pl.num_programs(1) - 1)
        def _():
            y = acc_ref[...] + b2_ref[...].astype(jnp.float32)
            o_ref[...] = (x_ref[...].astype(jnp.float32) + y).astype(o_ref.dtype)

    return kernel


def residual_block(x, gamma, beta, w1, b1, w2, b2, *, tm=512,
                   compute_dtype=jnp.bfloat16):
    """x: (..., H).  gamma/beta: (H,) LayerNorm affine.  w1/w2: (H, H) torch
    Linear weights (out, in); b1/b2: (H,).  Returns x + block(x)."""
    H = x.shape[-1]
    lead = x.shape[:-1]
    rows = math.prod(lead) if lead else 1
    out_dtype = x.dtype
    cd_bytes = jnp.dtype(compute_dtype).itemsize
    io_bytes = jnp.dtype(out_dtype).itemsize

    # --- VMEM capacity FIRST: every tiling decision derives from it. ---------
    try:
        vmem_cap = pltpu.get_tpu_info().vmem_capacity_bytes
    except Exception:
        vmem_cap = 64 * 1024 * 1024                 # conservative (v7x per-core)
    # Headroom for Mosaic internal scratch / pipeline slack (important on the
    # 64 MiB v7x part); cap at 100 MiB on the 128 MiB parts.
    vmem_budget = min(int(vmem_cap * 0.78), 100 * 1024 * 1024)
    # Weights may consume up to this much; we strongly prefer keeping them
    # fully resident (nk == 1) so they are fetched once per kernel instead of
    # once per row tile.
    weight_budget = int(vmem_budget * 0.70)

    lane_dense = (H % 128 == 0)
    # Pad the hidden axis only when we truly must (H not lane-dense AND the
    # full weights cannot stay resident even single-buffered).  For the common
    # small-H case this avoids host-side pad/slice copies of the activations,
    # which would multiply HBM traffic in an HBM-bound regime.
    must_pad = (not lane_dense) and (2 * H * H * cd_bytes > weight_budget)

    x2d = x.reshape(rows, H)
    if must_pad:
        width = max(128, _round_up(H, 128))
        pad = width - H
        x2d = jnp.pad(x2d, ((0, 0), (0, pad)))
        gamma = jnp.pad(gamma, (0, pad))
        beta = jnp.pad(beta, (0, pad))
        w1 = jnp.pad(w1, ((0, pad), (0, pad)))
        w2 = jnp.pad(w2, ((0, pad), (0, pad)))
        b1 = jnp.pad(b1, (0, pad))
        b2 = jnp.pad(b2, (0, pad))
    else:
        width = H
        pad = 0

    # torch Linear computes x @ W.T: pre-transpose once and cast to the MXU
    # compute dtype on the host (not per grid step inside the kernel).
    w1t = w1.T.astype(compute_dtype)                  # (width, width)
    w2t = w2.T.astype(compute_dtype)                  # (width, width)
    gamma2 = gamma.reshape(1, width).astype(jnp.float32)
    beta2 = beta.reshape(1, width).astype(jnp.float32)
    b1_2 = b1.reshape(1, width).astype(jnp.float32)
    b2_2 = b2.reshape(1, width).astype(jnp.float32)

    def _plan(weight_bufs):
        """Pick (nk, tk, tm) given the buffer count of grid-invariant weights."""
        full_w = 2 * width * width * cd_bytes * weight_bufs
        if width % 128 != 0:
            nk = 1                                    # cannot k-tile a non-lane-dense axis
        elif full_w <= weight_budget:
            nk = 1                                    # weights fully resident (preferred)
        else:
            hp_units = width // 128
            nk = hp_units
            # Prefer tk that is a multiple of 256 (full MXU width on v6e/v7x).
            for want_256 in (True, False):
                found = False
                for cand in range(2, hp_units + 1):
                    if hp_units % cand:
                        continue
                    tk_ = width // cand
                    if want_256 and tk_ % 256:
                        continue
                    if 2 * width * tk_ * cd_bytes * 2 <= weight_budget:
                        nk, found = cand, True
                        break
                if found:
                    break
        tk = width // nk
        w_bytes = 2 * width * tk * cd_bytes * (weight_bufs if nk == 1 else 2)

        # ---- row tile: big for MXU occupancy, clamped to VMEM ---------------
        tm_ = min(tm, _round_up(rows, 8))
        tm_ = max(8, _round_up(tm_, 8))
        # Guarantee >= 2 row tiles so the "parallel" row axis can shard across
        # v7x's 2 TensorCores (negligible grid-step cost on 1-TC chips).
        if rows >= 16:
            tm_ = min(tm_, max(8, _round_up((rows + 1) // 2, 8)))
        # When weights are k-tiled, flops-per-weight-byte == tm; keep tm large
        # so the per-row-tile weight re-fetch stays below the HBM roofline.
        tm_floor = 8 if nk == 1 else min(256, max(8, _round_up(rows, 8)))

        def est(tm__):
            act = tm__ * width * 4 * io_bytes         # x + out tiles, double-buffered
            scratch = tm__ * width * (cd_bytes + 4) if nk > 1 else 0
            params = 4 * (width + tk) * 4 * 2
            return act + scratch + params + w_bytes

        while tm_ > tm_floor and est(tm_) > vmem_budget:
            tm_ = max(tm_floor, _round_up(tm_ // 2, 8))
        return nk, tk, tm_

    flops = 4 * rows * width * width
    bytes_accessed = (2 * rows * width * io_bytes          # x in + out
                      + 2 * width * width * cd_bytes       # W1^T + W2^T
                      + 4 * width * 4)                      # gamma/beta/b1/b2
    cost = pl.CostEstimate(flops=flops, transcendentals=rows,
                           bytes_accessed=bytes_accessed)

    def _run(single_buffer):
        weight_bufs = 1 if single_buffer else 2
        nk, tk, tm_ = _plan(weight_bufs)
        grid_m = pl.cdiv(rows, tm_)
        inv_mode = pl.Buffered(1) if single_buffer else None

        def spec(shape, imap, mode=None):
            if mode is None:
                return pl.BlockSpec(shape, imap)
            return pl.BlockSpec(shape, imap, pipeline_mode=mode)

        if nk == 1:
            kernel = _make_fused_kernel(H, width)
            grid_spec = pltpu.PrefetchScalarGridSpec(
                num_scalar_prefetch=0,
                grid=(grid_m,),
                in_specs=[
                    spec((tm_, width), lambda i: (i, 0)),               # x rows
                    spec((1, width), lambda i: (0, 0), inv_mode),       # gamma
                    spec((1, width), lambda i: (0, 0), inv_mode),       # beta
                    spec((width, width), lambda i: (0, 0), inv_mode),   # W1^T
                    spec((1, width), lambda i: (0, 0), inv_mode),       # b1
                    spec((width, width), lambda i: (0, 0), inv_mode),   # W2^T
                    spec((1, width), lambda i: (0, 0), inv_mode),       # b2
                ],
                out_specs=spec((tm_, width), lambda i: (i, 0)),
            )
            dims = ("parallel",)
        else:
            kernel = _make_ktiled_kernel(H, width)
            grid_spec = pltpu.PrefetchScalarGridSpec(
                num_scalar_prefetch=0,
                grid=(grid_m, nk),
                in_specs=[
                    spec((tm_, width), lambda i, k: (i, 0)),            # x rows (resident over k)
                    spec((1, width), lambda i, k: (0, 0), inv_mode),    # gamma
                    spec((1, width), lambda i, k: (0, 0), inv_mode),    # beta
                    spec((width, tk), lambda i, k: (0, k)),             # W1^T k-slice
                    spec((1, tk), lambda i, k: (0, k)),                 # b1 k-slice
                    spec((tk, width), lambda i, k: (k, 0)),             # W2^T k-slice
                    spec((1, width), lambda i, k: (0, 0), inv_mode),    # b2
                ],
                out_specs=spec((tm_, width), lambda i, k: (i, 0)),
                scratch_shapes=[
                    pltpu.VMEM((tm_, width), compute_dtype),            # cached LayerNorm(x)
                    pltpu.VMEM((tm_, width), jnp.float32),              # y accumulator
                ],
            )
            dims = ("parallel", "arbitrary")

        return pl.pallas_call(
            kernel,
            out_shape=jax.ShapeDtypeStruct((rows, width), out_dtype),
            grid_spec=grid_spec,
            cost_estimate=cost,
            compiler_params=pltpu.CompilerParams(
                dimension_semantics=dims,
                vmem_limit_bytes=int(vmem_budget)),
        )(x2d, gamma2, beta2, w1t, b1_2, w2t, b2_2)

    if hasattr(pl, "Buffered"):
        try:
            out = _run(True)
        except Exception:
            # Fallback if this Pallas build rejects single-buffered specs.  The
            # fallback re-plans (nk, tk, tm) with double-buffered weights so its
            # VMEM footprint is validated, not inherited from the Buffered plan.
            out = _run(False)
    else:
        out = _run(False)

    if pad:
        out = out[:, :H]
    return out.reshape(*lead, H)


def reference(x, gamma, beta, w1, b1, w2, b2, compute_dtype=jnp.float32):
    """Plain-JAX reference mirroring the PyTorch forward.  With
    compute_dtype=bf16 it also mirrors the kernel's MXU operand precision."""
    xf = x.astype(jnp.float32)
    mean = jnp.mean(xf, axis=-1, keepdims=True)
    var = jnp.mean((xf - mean) ** 2, axis=-1, keepdims=True)
    xn = (xf - mean) * jax.lax.rsqrt(var + 1e-5) * gamma + beta
    h = jnp.dot(xn.astype(compute_dtype), w1.T.astype(compute_dtype),
                preferred_element_type=jnp.float32) + b1
    h = jnp.where(h >= 0, h, 0.01 * h)
    y = jnp.dot(h.astype(compute_dtype), w2.T.astype(compute_dtype),
                preferred_element_type=jnp.float32) + b2
    return (xf + y).astype(x.dtype)


if __name__ == "__main__":
    key = jax.random.PRNGKey(0)
    B, S, H = 2, 8, 32          # batch=2, seq=8, hidden=32
    k_x, k_g, k_b, k_w1, k_b1, k_w2, k_b2 = jax.random.split(key, 7)

    x = jax.random.normal(k_x, (B, S, H), dtype=jnp.float32)

    # Deterministic synthetic parameters (shapes follow nn.LayerNorm / nn.Linear)
    gamma = 1.0 + 0.1 * jax.random.normal(k_g, (H,), dtype=jnp.float32)
    beta = 0.1 * jax.random.normal(k_b, (H,), dtype=jnp.float32)
    bound = 1.0 / math.sqrt(H)
    w1 = jax.random.uniform(k_w1, (H, H), minval=-bound, maxval=bound, dtype=jnp.float32)
    b1 = jax.random.uniform(k_b1, (H,), minval=-bound, maxval=bound, dtype=jnp.float32)
    w2 = jax.random.uniform(k_w2, (H, H), minval=-bound, maxval=bound, dtype=jnp.float32)
    b2 = jax.random.uniform(k_b2, (H,), minval=-bound, maxval=bound, dtype=jnp.float32)

    out = residual_block(x, gamma, beta, w1, b1, w2, b2)
    out = jax.block_until_ready(out)
    assert out.shape == x.shape

    # Tight check against a reference mirroring the kernel's bf16 MXU operands.
    ref_bf16 = reference(x, gamma, beta, w1, b1, w2, b2, compute_dtype=jnp.bfloat16)
    err_bf16 = jnp.max(jnp.abs(out - ref_bf16))
    assert jnp.allclose(out, ref_bf16, atol=5e-3, rtol=5e-3), \
        f"max err vs bf16-mirrored ref {err_bf16}"

    # Loose check against the exact f32 PyTorch semantics (bf16-operand tolerance).
    ref_f32 = reference(x, gamma, beta, w1, b1, w2, b2, compute_dtype=jnp.float32)
    err_f32 = jnp.max(jnp.abs(out - ref_f32))
    assert jnp.allclose(out, ref_f32, atol=1e-1, rtol=1e-1), \
        f"max err vs f32 ref {err_f32}"

    print("KERNEL_OK")
</pallas_src>

<mosaic_0001>
module attributes {stable_mosaic.version = 11 : i64} {
  func.func @kernel(%arg0: i32, %arg1: memref<8x32xf32, #tpu.memory_space<vmem>>, %arg2: memref<1x32xf32, #tpu.memory_space<vmem>>, %arg3: memref<1x32xf32, #tpu.memory_space<vmem>>, %arg4: memref<32x32xbf16, #tpu.memory_space<vmem>>, %arg5: memref<1x32xf32, #tpu.memory_space<vmem>>, %arg6: memref<32x32xbf16, #tpu.memory_space<vmem>>, %arg7: memref<1x32xf32, #tpu.memory_space<vmem>>, %arg8: memref<8x32xf32, #tpu.memory_space<vmem>>) attributes {dimension_semantics = [#tpu.dimension_semantics<parallel>], iteration_bounds = array<i64: 2>, scalar_prefetch = 0 : i64, scratch_operands = 0 : i64, tpu.core_type = #tpu.core_type<tc>, window_params = [{transform_indices = @transform_0, window_bounds = array<i64: 8, 32>}, {pipeline_mode = #tpu.pipeline_mode<synchronous>, transform_indices = @transform_1, window_bounds = array<i64: 1, 32>}, {pipeline_mode = #tpu.pipeline_mode<synchronous>, transform_indices = @transform_2, window_bounds = array<i64: 1, 32>}, {pipeline_mode = #tpu.pipeline_mode<synchronous>, transform_indices = @transform_3, window_bounds = array<i64: 32, 32>}, {pipeline_mode = #tpu.pipeline_mode<synchronous>, transform_indices = @transform_4, window_bounds = array<i64: 1, 32>}, {pipeline_mode = #tpu.pipeline_mode<synchronous>, transform_indices = @transform_5, window_bounds = array<i64: 32, 32>}, {pipeline_mode = #tpu.pipeline_mode<synchronous>, transform_indices = @transform_6, window_bounds = array<i64: 1, 32>}, {transform_indices = @transform_7, window_bounds = array<i64: 8, 32>}]} {
    %c0 = arith.constant 0 : index
    %c0_0 = arith.constant 0 : index
    %0 = vector.load %arg1[%c0, %c0_0] : memref<8x32xf32, #tpu.memory_space<vmem>>, vector<8x32xf32>
    %cst = arith.constant dense<0.000000e+00> : vector<8xf32>
    %1 = vector.multi_reduction <add>, %0, %cst [1] : vector<8x32xf32> to vector<8xf32>
    %2 = vector.shape_cast %1 : vector<8xf32> to vector<8x1xf32>
    %cst_1 = arith.constant 3.125000e-02 : f32
    %3 = vector.broadcast %cst_1 : f32 to vector<8x1xf32>
    %4 = arith.mulf %2, %3 : vector<8x1xf32>
    %5 = vector.broadcast %4 : vector<8x1xf32> to vector<8x32xf32>
    %6 = arith.subf %0, %5 : vector<8x32xf32>
    %7 = arith.mulf %6, %6 : vector<8x32xf32>
    %cst_2 = arith.constant dense<0.000000e+00> : vector<8xf32>
    %8 = vector.multi_reduction <add>, %7, %cst_2 [1] : vector<8x32xf32> to vector<8xf32>
    %9 = vector.shape_cast %8 : vector<8xf32> to vector<8x1xf32>
    %cst_3 = arith.constant 3.125000e-02 : f32
    %10 = vector.broadcast %cst_3 : f32 to vector<8x1xf32>
    %11 = arith.mulf %9, %10 : vector<8x1xf32>
    %cst_4 = arith.constant 9.99999974E-6 : f32
    %12 = vector.broadcast %cst_4 : f32 to vector<8x1xf32>
    %13 = arith.addf %11, %12 : vector<8x1xf32>
    %14 = math.rsqrt %13 : vector<8x1xf32>
    %15 = vector.broadcast %14 : vector<8x1xf32> to vector<8x32xf32>
    %16 = arith.mulf %6, %15 : vector<8x32xf32>
    %c0_5 = arith.constant 0 : index
    %c0_6 = arith.constant 0 : index
    %17 = vector.load %arg2[%c0_5, %c0_6] : memref<1x32xf32, #tpu.memory_space<vmem>>, vector<1x32xf32>
    %18 = vector.broadcast %17 : vector<1x32xf32> to vector<8x32xf32>
    %19 = arith.mulf %16, %18 : vector<8x32xf32>
    %c0_7 = arith.constant 0 : index
    %c0_8 = arith.constant 0 : index
    %20 = vector.load %arg3[%c0_7, %c0_8] : memref<1x32xf32, #tpu.memory_space<vmem>>, vector<1x32xf32>
    %21 = vector.broadcast %20 : vector<1x32xf32> to vector<8x32xf32>
    %22 = arith.addf %19, %21 : vector<8x32xf32>
    %23 = arith.truncf %22 : vector<8x32xf32> to vector<8x32xbf16>
    %c0_9 = arith.constant 0 : index
    %c0_10 = arith.constant 0 : index
    %24 = vector.load %arg4[%c0_9, %c0_10] : memref<32x32xbf16, #tpu.memory_space<vmem>>, vector<32x32xbf16>
    %cst_11 = arith.constant dense<0.000000e+00> : vector<8x32xf32>
    %25 = tpu.matmul %23, %24, %cst_11 {dimension_numbers = #tpu.dot_dimension_numbers<[1], [0], [0], [1], [0, 0, 1, 1], [], []>} : vector<8x32xbf16>, vector<32x32xbf16>, vector<8x32xf32> -> vector<8x32xf32>
    %c0_12 = arith.constant 0 : index
    %c0_13 = arith.constant 0 : index
    %26 = vector.load %arg5[%c0_12, %c0_13] : memref<1x32xf32, #tpu.memory_space<vmem>>, vector<1x32xf32>
    %27 = vector.broadcast %26 : vector<1x32xf32> to vector<8x32xf32>
    %28 = arith.addf %25, %27 : vector<8x32xf32>
    %cst_14 = arith.constant 0.00999999977 : f32
    %29 = vector.broadcast %cst_14 : f32 to vector<8x32xf32>
    %30 = arith.mulf %29, %28 : vector<8x32xf32>
    %31 = arith.maximumf %28, %30 : vector<8x32xf32>
    %32 = arith.truncf %31 : vector<8x32xf32> to vector<8x32xbf16>
    %c0_15 = arith.constant 0 : index
    %c0_16 = arith.constant 0 : index
    %33 = vector.load %arg6[%c0_15, %c0_16] : memref<32x32xbf16, #tpu.memory_space<vmem>>, vector<32x32xbf16>
    %cst_17 = arith.constant dense<0.000000e+00> : vector<8x32xf32>
    %34 = tpu.matmul %32, %33, %cst_17 {dimension_numbers = #tpu.dot_dimension_numbers<[1], [0], [0], [1], [0, 0, 1, 1], [], []>} : vector<8x32xbf16>, vector<32x32xbf16>, vector<8x32xf32> -> vector<8x32xf32>
    %c0_18 = arith.constant 0 : index
    %c0_19 = arith.constant 0 : index
    %35 = vector.load %arg7[%c0_18, %c0_19] : memref<1x32xf32, #tpu.memory_space<vmem>>, vector<1x32xf32>
    %36 = vector.broadcast %35 : vector<1x32xf32> to vector<8x32xf32>
    %37 = arith.addf %34, %36 : vector<8x32xf32>
    %38 = arith.addf %0, %37 : vector<8x32xf32>
    %c0_20 = arith.constant 0 : index
    %c0_21 = arith.constant 0 : index
    %39 = vector.load %arg8[%c0_20, %c0_21] : memref<8x32xf32, #tpu.memory_space<vmem>>, vector<8x32xf32>
    tpu.vector_store %arg8[%c0_20, %c0_21], %38 {strides = array<i32>} : memref<8x32xf32, #tpu.memory_space<vmem>>, vector<8x32xf32>,
    return
  }
  func.func @transform_0(%arg0: i32) -> (i32, i32) {
    %c0_i32 = arith.constant 0 : i32
    %c0_i32_0 = arith.constant 0 : i32
    return %arg0, %c0_i32 : i32, i32
  }
  func.func @transform_1(%arg0: i32) -> (i32, i32) {
    %c0_i32 = arith.constant 0 : i32
    %c0_i32_0 = arith.constant 0 : i32
    %c0_i32_1 = arith.constant 0 : i32
    return %c0_i32, %c0_i32_0 : i32, i32
  }
  func.func @transform_2(%arg0: i32) -> (i32, i32) {
    %c0_i32 = arith.constant 0 : i32
    %c0_i32_0 = arith.constant 0 : i32
    %c0_i32_1 = arith.constant 0 : i32
    return %c0_i32, %c0_i32_0 : i32, i32
  }
  func.func @transform_3(%arg0: i32) -> (i32, i32) {
    %c0_i32 = arith.constant 0 : i32
    %c0_i32_0 = arith.constant 0 : i32
    %c0_i32_1 = arith.constant 0 : i32
    return %c0_i32, %c0_i32_0 : i32, i32
  }
  func.func @transform_4(%arg0: i32) -> (i32, i32) {
    %c0_i32 = arith.constant 0 : i32
    %c0_i32_0 = arith.constant 0 : i32
    %c0_i32_1 = arith.constant 0 : i32
    return %c0_i32, %c0_i32_0 : i32, i32
  }
  func.func @transform_5(%arg0: i32) -> (i32, i32) {
    %c0_i32 = arith.constant 0 : i32
    %c0_i32_0 = arith.constant 0 : i32
    %c0_i32_1 = arith.constant 0 : i32
    return %c0_i32, %c0_i32_0 : i32, i32
  }
  func.func @transform_6(%arg0: i32) -> (i32, i32) {
    %c0_i32 = arith.constant 0 : i32
    %c0_i32_0 = arith.constant 0 : i32
    %c0_i32_1 = arith.constant 0 : i32
    return %c0_i32, %c0_i32_0 : i32, i32
  }
  func.func @transform_7(%arg0: i32) -> (i32, i32) {
    %c0_i32 = arith.constant 0 : i32
    %c0_i32_0 = arith.constant 0 : i32
    return %arg0, %c0_i32 : i32, i32
  }
}

module attributes {stable_mosaic.version = 11 : i64} {
  func.func @kernel(%arg0: i32, %arg1: memref<8x32xf32, #tpu.memory_space<vmem>>, %arg2: memref<1x32xf32, #tpu.memory_space<vmem>>, %arg3: memref<1x32xf32, #tpu.memory_space<vmem>>, %arg4: memref<32x32xbf16, #tpu.memory_space<vmem>>, %arg5: memref<1x32xf32, #tpu.memory_space<vmem>>, %arg6: memref<32x32xbf16, #tpu.memory_space<vmem>>, %arg7: memref<1x32xf32, #tpu.memory_space<vmem>>, %arg8: memref<8x32xf32, #tpu.memory_space<vmem>>) attributes {dimension_semantics = [#tpu.dimension_semantics<parallel>], iteration_bounds = array<i64: 2>, scalar_prefetch = 0 : i64, scratch_operands = 0 : i64, tpu.core_type = #tpu.core_type<tc>, window_params = [{transform_indices = @transform_0, window_bounds = array<i64: 8, 32>}, {pipeline_mode = #tpu.pipeline_mode<synchronous>, transform_indices = @transform_1, window_bounds = array<i64: 1, 32>}, {pipeline_mode = #tpu.pipeline_mode<synchronous>, transform_indices = @transform_2, window_bounds = array<i64: 1, 32>}, {pipeline_mode = #tpu.pipeline_mode<synchronous>, transform_indices = @transform_3, window_bounds = array<i64: 32, 32>}, {pipeline_mode = #tpu.pipeline_mode<synchronous>, transform_indices = @transform_4, window_bounds = array<i64: 1, 32>}, {pipeline_mode = #tpu.pipeline_mode<synchronous>, transform_indices = @transform_5, window_bounds = array<i64: 32, 32>}, {pipeline_mode = #tpu.pipeline_mode<synchronous>, transform_indices = @transform_6, window_bounds = array<i64: 1, 32>}, {transform_indices = @transform_7, window_bounds = array<i64: 8, 32>}]} {
    %c0 = arith.constant 0 : index
    %c0_0 = arith.constant 0 : index
    %0 = vector.load %arg1[%c0, %c0_0] : memref<8x32xf32, #tpu.memory_space<vmem>>, vector<8x32xf32>
    %cst = arith.constant dense<0.000000e+00> : vector<8xf32>
    %1 = vector.multi_reduction <add>, %0, %cst [1] : vector<8x32xf32> to vector<8xf32>
    %2 = vector.shape_cast %1 : vector<8xf32> to vector<8x1xf32>
    %cst_1 = arith.constant 3.125000e-02 : f32
    %3 = vector.broadcast %cst_1 : f32 to vector<8x1xf32>
    %4 = arith.mulf %2, %3 : vector<8x1xf32>
    %5 = vector.broadcast %4 : vector<8x1xf32> to vector<8x32xf32>
    %6 = arith.subf %0, %5 : vector<8x32xf32>
    %7 = arith.mulf %6, %6 : vector<8x32xf32>
    %cst_2 = arith.constant dense<0.000000e+00> : vector<8xf32>
    %8 = vector.multi_reduction <add>, %7, %cst_2 [1] : vector<8x32xf32> to vector<8xf32>
    %9 = vector.shape_cast %8 : vector<8xf32> to vector<8x1xf32>
    %cst_3 = arith.constant 3.125000e-02 : f32
    %10 = vector.broadcast %cst_3 : f32 to vector<8x1xf32>
    %11 = arith.mulf %9, %10 : vector<8x1xf32>
    %cst_4 = arith.constant 9.99999974E-6 : f32
    %12 = vector.broadcast %cst_4 : f32 to vector<8x1xf32>
    %13 = arith.addf %11, %12 : vector<8x1xf32>
    %14 = math.rsqrt %13 : vector<8x1xf32>
    %15 = vector.broadcast %14 : vector<8x1xf32> to vector<8x32xf32>
    %16 = arith.mulf %6, %15 : vector<8x32xf32>
    %c0_5 = arith.constant 0 : index
    %c0_6 = arith.constant 0 : index
    %17 = vector.load %arg2[%c0_5, %c0_6] : memref<1x32xf32, #tpu.memory_space<vmem>>, vector<1x32xf32>
    %18 = vector.broadcast %17 : vector<1x32xf32> to vector<8x32xf32>
    %19 = arith.mulf %16, %18 : vector<8x32xf32>
    %c0_7 = arith.constant 0 : index
    %c0_8 = arith.constant 0 : index
    %20 = vector.load %arg3[%c0_7, %c0_8] : memref<1x32xf32, #tpu.memory_space<vmem>>, vector<1x32xf32>
    %21 = vector.broadcast %20 : vector<1x32xf32> to vector<8x32xf32>
    %22 = arith.addf %19, %21 : vector<8x32xf32>
    %23 = arith.truncf %22 : vector<8x32xf32> to vector<8x32xbf16>
    %c0_9 = arith.constant 0 : index
    %c0_10 = arith.constant 0 : index
    %24 = vector.load %arg4[%c0_9, %c0_10] : memref<32x32xbf16, #tpu.memory_space<vmem>>, vector<32x32xbf16>
    %cst_11 = arith.constant dense<0.000000e+00> : vector<8x32xf32>
    %25 = tpu.matmul %23, %24, %cst_11 {dimension_numbers = #tpu.dot_dimension_numbers<[1], [0], [0], [1], [0, 0, 1, 1], [], []>} : vector<8x32xbf16>, vector<32x32xbf16>, vector<8x32xf32> -> vector<8x32xf32>
    %c0_12 = arith.constant 0 : index
    %c0_13 = arith.constant 0 : index
    %26 = vector.load %arg5[%c0_12, %c0_13] : memref<1x32xf32, #tpu.memory_space<vmem>>, vector<1x32xf32>
    %27 = vector.broadcast %26 : vector<1x32xf32> to vector<8x32xf32>
    %28 = arith.addf %25, %27 : vector<8x32xf32>
    %cst_14 = arith.constant 0.00999999977 : f32
    %29 = vector.broadcast %cst_14 : f32 to vector<8x32xf32>
    %30 = arith.mulf %29, %28 : vector<8x32xf32>
    %31 = arith.maximumf %28, %30 : vector<8x32xf32>
    %32 = arith.truncf %31 : vector<8x32xf32> to vector<8x32xbf16>
    %c0_15 = arith.constant 0 : index
    %c0_16 = arith.constant 0 : index
    %33 = vector.load %arg6[%c0_15, %c0_16] : memref<32x32xbf16, #tpu.memory_space<vmem>>, vector<32x32xbf16>
    %cst_17 = arith.constant dense<0.000000e+00> : vector<8x32xf32>
    %34 = tpu.matmul %32, %33, %cst_17 {dimension_numbers = #tpu.dot_dimension_numbers<[1], [0], [0], [1], [0, 0, 1, 1], [], []>} : vector<8x32xbf16>, vector<32x32xbf16>, vector<8x32xf32> -> vector<8x32xf32>
    %c0_18 = arith.constant 0 : index
    %c0_19 = arith.constant 0 : index
    %35 = vector.load %arg7[%c0_18, %c0_19] : memref<1x32xf32, #tpu.memory_space<vmem>>, vector<1x32xf32>
    %36 = vector.broadcast %35 : vector<1x32xf32> to vector<8x32xf32>
    %37 = arith.addf %34, %36 : vector<8x32xf32>
    %38 = arith.addf %0, %37 : vector<8x32xf32>
    %c0_20 = arith.constant 0 : index
    %c0_21 = arith.constant 0 : index
    %39 = vector.load %arg8[%c0_20, %c0_21] : memref<8x32xf32, #tpu.memory_space<vmem>>, vector<8x32xf32>
    tpu.vector_store %arg8[%c0_20, %c0_21], %38 {strides = array<i32>} : memref<8x32xf32, #tpu.memory_space<vmem>>, vector<8x32xf32>,
    return
  }
  func.func @transform_0(%arg0: i32) -> (i32, i32) {
    %c0_i32 = arith.constant 0 : i32
    %c0_i32_0 = arith.constant 0 : i32
    return %arg0, %c0_i32 : i32, i32
  }
  func.func @transform_1(%arg0: i32) -> (i32, i32) {
    %c0_i32 = arith.constant 0 : i32
    %c0_i32_0 = arith.constant 0 : i32
    %c0_i32_1 = arith.constant 0 : i32
    return %c0_i32, %c0_i32_0 : i32, i32
  }
  func.func @transform_2(%arg0: i32) -> (i32, i32) {
    %c0_i32 = arith.constant 0 : i32
    %c0_i32_0 = arith.constant 0 : i32
    %c0_i32_1 = arith.constant 0 : i32
    return %c0_i32, %c0_i32_0 : i32, i32
  }
  func.func @transform_3(%arg0: i32) -> (i32, i32) {
    %c0_i32 = arith.constant 0 : i32
    %c0_i32_0 = arith.constant 0 : i32
    %c0_i32_1 = arith.constant 0 : i32
    return %c0_i32, %c0_i32_0 : i32, i32
  }
  func.func @transform_4(%arg0: i32) -> (i32, i32) {
    %c0_i32 = arith.constant 0 : i32
    %c0_i32_0 = arith.constant 0 : i32
    %c0_i32_1 = arith.constant 0 : i32
    return %c0_i32, %c0_i32_0 : i32, i32
  }
  func.func @transform_5(%arg0: i32) -> (i32, i32) {
    %c0_i32 = arith.constant 0 : i32
    %c0_i32_0 = arith.constant 0 : i32
    %c0_i32_1 = arith.constant 0 : i32
    return %c0_i32, %c0_i32_0 : i32, i32
  }
  func.func @transform_6(%arg0: i32) -> (i32, i32) {
    %c0_i32 = arith.constant 0 : i32
    %c0_i32_0 = arith.constant 0 : i32
    %c0_i32_1 = arith.constant 0 : i32
    return %c0_i32, %c0_i32_0 : i32, i32
  }
  func.func @transform_7(%arg0: i32) -> (i32, i32) {
    %c0_i32 = arith.constant 0 : i32
    %c0_i32_0 = arith.constant 0 : i32
    return %arg0, %c0_i32 : i32, i32
  }
}

</mosaic_0001>

<bundles_post_ra>
// kernel: tpu_custom_call.1
= control target key start
LH: loop header
LB: loop body
LE: loop exit
PB: predicated region body
PF: predicated region fallthrough
CT: control target
= control target key end

     0   :  { %12 = vsyncpa [#allocation3], 0  ;;  %s1179_s0 = inlined_call_operand.hbm [shape: f32[16,32], index: 0, kind: input, shape index: {}]   ;;  %s1180_s1 = inlined_call_operand.vmem [shape: f32[1,32], index: 1, kind: input, shape index: {}]   ;;  %s1181_s2 = inlined_call_operand.vmem [shape: f32[1,32], index: 2, kind: input, shape index: {}]   ;;  %s1182_s3 = inlined_call_operand.hbm [shape: bf16[32,32], index: 3, kind: input, shape index: {}]   ;;  %s1183_s4 = inlined_call_operand.hbm [shape: f32[1,32], index: 4, kind: input, shape index: {}]   ;;  %s1184_s5 = inlined_call_operand.vmem [shape: bf16[32,32], index: 5, kind: input, shape index: {}]   ;;  %s1185_s6 = inlined_call_operand.vmem [shape: f32[1,32], index: 6, kind: input, shape index: {}]   ;;  %s1186_s7 = inlined_call_operand.hbm [shape: f32[16,32], index: 7, kind: output, shape index: {}]  }
   0x1   :  { %14 = vsyncpa [#allocation3 + $0x1], 0 }
   0x2   :  { %15 = vsyncpa [#allocation6], 0 }
   0x3   :  { %16 = vsyncpa [#allocation4], 0 }
   0x4   :  { %18 = vsyncpa [#allocation4 + $0x1], 0  ;;  %s925_s24 = smov 0   ;;  %s927_s25 = smov 0  }
   0x5   :  { %s929_s26 = smov 0   ;;  %s931_s27 = smov 0  }
   0x6 LB: > { %s946_s28 = sadd.s32 4294967295, %s875_s27   ;;  %s594_s29 = sadd.s32 4294967294, %s875_s27   ;;  %s875_s27 = sphi %s931_s27, %s1206_s27   ;;  %s871_s26 = sphi %s929_s26, %s1205_s26   ;;  %s867_s25 = sphi %s927_s25, %s1204_s25   ;;  %s863_s24 = sphi %s925_s24, %s1203_s24  }
   0x7   : > { %p44_p0 = scmp.ne.s32.totalorder %s867_s25, %s863_s24  ;;  %p1187_p1 = scmp.eq.s32.totalorder %s946_s28, 0 }
   0x8   : > { %p200_p3 = scmp.eq.s32.totalorder %s594_s29, 1  ;;  %p595_p5 = scmp.ge.s32.totalorder %s875_s27, 1 }
   0x9   : > { %p955_p4 = por %p1187_p1, %p44_p0  ;;  %p207_p7 = scmp.lt.s32.totalorder %s875_s27, 3 }
   0xa   : > { %p960_p6 = por %p200_p3, %p44_p0  ;;  %s877_s10 = smov [#allocation5]  }
   0xb   : > { %s1190_s30 = scalar_select %p955_p4, 1, 0 }
   0xc   : > { %s1191_s8 = scalar_select %p960_p6, 1, 0 }
   0xd   : > { %p965_p8 = pnand %p595_p5, %p207_p7  ;;  %s225_s11 = sshll.u32 %s877_s10, 4  ;;  %s969_s11 = int_to_ptr.vmem [resolvable:$true] %s225_s11 }
   0xe   : > { %s878_s13 = smov [#allocation7]   ;;  %s719_s17 = scalar_lea.hbm %s1182_s3, 256 }
   0xf   : > { %p654_p9 = pneg %p965_p8  ;;  %s239_s14 = sshll.u32 %s878_s13, 4  ;;  %s980_s14 = int_to_ptr.vmem [resolvable:$true] %s239_s14 }
  0x10   : > { %p720_p12 = scmp.ne.s32.totalorder %s1182_s3, %s719_s17  ;;  %p726_p5 = scmp.lt.u32.totalorder %s719_s17, %s1182_s3 }
  0x11   : > { %p976_p11 = pnand %p654_p9, %p1187_p1 }
  0x13   : > { %p721_p13 = pneg %p976_p11 }
  0x15   : > { %p722_p0 = pnand %p721_p13, %p720_p12 }
  0x17   : > { %p723_p3 = pneg %p722_p0 }
  0x19   : > { %p728_p7 = pnand %p726_p5, %p723_p3 }
  0x1b   : > { %731 = shalt.err (!%p728_p7)
}
  0x1c   : > { %s732_s22 = scalar_lea.vmem %s969_s11, 256  ;;  %p740_p2 = scmp.lt.s32.totalorder %s969_s11, %s969_s11 }
  0x1d   : > { %p733_p9 = scmp.ne.s32.totalorder %s969_s11, %s732_s22  ;;  %p741_p12 = scmp.lt.s32.totalorder %s732_s22, %s732_s22 }
  0x1f   : > { %p735_p10 = pnand %p733_p9, %p721_p13  ;;  %p742_p0 = por %p741_p12, %p740_p2 }
  0x21   : > { %p736_p1 = pneg %p735_p10 }
  0x23   : > { %p743_p6 = pnand %p742_p0, %p736_p1 }
  0x25   : > { %746 = shalt.err (!%p743_p6)
}
  0x26   : > { %s879_s23 = smov 64   ;;  %s880_s29 = smov 4  }
  0x27   : > { %657 = dma.hbm_to_vmem [thread:$0]  (!%p976_p11), %s1182_s3, 256, %s969_s11, [#allocation6], %s879_s23, %s879_s23, %s880_s29  }
  0x28   : > { %s747_s17 = scalar_lea.hbm %s1183_s4, 16 }
  0x29   : > { %p748_p2 = scmp.ne.s32.totalorder %s1183_s4, %s747_s17  ;;  %p754_p10 = scmp.lt.u32.totalorder %s747_s17, %s1183_s4 }
  0x2b   : > { %p750_p1 = pnand %p748_p2, %p721_p13 }
  0x2d   : > { %p751_p6 = pneg %p750_p1 }
  0x2f   : > { %p756_p3 = pnand %p754_p10, %p751_p6 }
  0x31   : > { %759 = shalt.err (!%p756_p3)
}
  0x32   : > { %s760_s11 = scalar_lea.vmem %s980_s14, 16  ;;  %s767_s22 = scalar_lea.vmem %s980_s14, 32 }
  0x33   : > { %p761_p5 = scmp.ne.s32.totalorder %s980_s14, %s760_s11  ;;  %p768_p12 = scmp.lt.s32.totalorder %s980_s14, %s980_s14 }
  0x34   : > { %p769_p0 = scmp.lt.s32.totalorder %s767_s22, %s760_s11 }
  0x35   : > { %p763_p7 = pnand %p761_p5, %p721_p13 }
  0x36   : > { %p770_p2 = por %p769_p0, %p768_p12 }
  0x37   : > { %p764_p9 = pneg %p763_p7 }
  0x39   : > { %p771_p1 = pnand %p770_p2, %p764_p9 }
  0x3b   : > { %774 = shalt.err (!%p771_p1)
}
  0x3c   : > { %660 = dma.hbm_to_vmem [thread:$0]  (!%p976_p11), %s1183_s4, 16, %s980_s14, [#allocation6]  }
  0x3d   : > { %s1036_s10 = sadd.s32 1, %s875_s27   ;;  %s31_s12 = sadd.s32 1, %s871_s26 }
  0x3e   : > { %s28_s13 = ssub.s32 %s875_s27, %s1036_s10  ;;  %p38_p13 = scmp.ne.s32.totalorder %s871_s26, %s867_s25 }
  0x3f   : > { %p29_p6 = scmp.eq.s32.totalorder %s28_s13, 0  ;;  %p39_p10 = scmp.eq.s32.totalorder %s875_s27, 0 }
  0x40   : > { %p1194_p3 = scmp.eq.s32.totalorder %s946_s28, 1  ;;  %p671_p7 = scmp.lt.s32.totalorder %s875_s27, 2 }
  0x41   : > { %s1052_s16 = scalar_select %p29_p6, %s871_s26, %s31_s12  }
  0x42   : > { %p1046_p5 = por %p1194_p3, %p38_p13  ;;  %p40_p9 = por %p39_p10, %p38_p13 }
  0x43   : > { %s256_s17 = sand.u32 1, %s871_s26   ;;  %s600_s14 = sshll.u32 %s875_s27, 7 }
  0x44   : > { %s1195_s15 = scalar_select %p1046_p5, 1, 0 }
  0x45   : > { %s599_s18 = sshll.u32 %s256_s17, 3  ;;  %s1059_s21 = scalar_lea.hbm %s1179_s0, %s600_s14 }
  0x46   : > { %s260_s11 = scalar_lea.vmem [#allocation2], %s599_s18  ;;  %p1063_p11 = pnand %p671_p7, %p40_p9 }
  0x47   : > { %s267_s22 = sshll.u32 %s260_s11, 4  ;;  %s257_s29 = scalar_lea.sflag [#allocation3], %s256_s17  ;;  %s1061_s22 = int_to_ptr.vmem [resolvable:$true] %s267_s22 }
  0x48   : > { %s775_s12 = scalar_lea.hbm %s1059_s21, 128  ;;  %p777_p0 = pneg %p1063_p11 }
  0x49   : > { %p776_p12 = scmp.ne.s32.totalorder %s1059_s21, %s775_s12  ;;  %s780_s14 = scalar_lea.hbm %s1179_s0, 256 }
  0x4a   : > { %p781_p13 = scmp.lt.u32.totalorder %s1059_s21, %s1179_s0  ;;  %p782_p6 = scmp.lt.u32.totalorder %s780_s14, %s775_s12 }
  0x4b   : > { %p778_p2 = pnand %p777_p0, %p776_p12  ;;  %p784_p3 = scmp.lt.u32.totalorder %s775_s12, %s1059_s21 }
  0x4c   : > { %p783_p10 = por %p782_p6, %p781_p13 }
  0x4d   : > { %p779_p1 = pneg %p778_p2 }
  0x4e   : > { %p785_p7 = por %p784_p3, %p783_p10 }
  0x50   : > { %p786_p9 = pnand %p785_p7, %p779_p1 }
  0x52   : > { %789 = shalt.err (!%p786_p9)
}
  0x53   : > { %s790_s17 = scalar_lea.vmem %s1061_s22, 128  ;;  %s881_s11 = smov [#allocation2]  }
  0x54   : > { %p791_p12 = scmp.ne.s32.totalorder %s1061_s22, %s790_s17  ;;  %s795_s13 = sshll.u32 %s881_s11, 4  ;;  %s796_s13 = int_to_ptr.vmem [resolvable:$false] %s795_s13 }
  0x55   : > { %s797_s18 = scalar_lea.vmem %s796_s13, 256  ;;  %p798_p4 = scmp.lt.s32.totalorder %s1061_s22, %s796_s13 }
  0x56   : > { %p793_p2 = pnand %p791_p12, %p777_p0  ;;  %p799_p13 = scmp.lt.s32.totalorder %s797_s18, %s790_s17 }
  0x58   : > { %p794_p5 = pneg %p793_p2  ;;  %p800_p6 = por %p799_p13, %p798_p4 }
  0x5a   : > { %p801_p10 = pnand %p800_p6, %p794_p5 }
  0x5c   : > { %804 = shalt.err (!%p801_p10)
}
  0x5d   : > { %664 = dma.hbm_to_vmem [thread:$0]  (!%p1063_p11), %s1059_s21, 128, %s1061_s22, %s257_s29  }
  0x5e   : > { %276 = sbr.rel (%p965_p8) target bundleno = 871 (0x367), region = 48  ;;  %s1095_s12 = sand.u32 (!%p965_p8), 1, %s867_s25  }
  0x5f   : > { %s602_s14 = sshll.u32 (!%p965_p8), %s1095_s12, 3  ;;  %s279_s19 = scalar_lea.sflag (!%p965_p8), [#allocation3], %s1095_s12 }
  0x60   : > { %s282_s20 = scalar_lea.vmem (!%p965_p8), [#allocation2], %s602_s14  ;;  %p1197_p4 = scmp.ne.s32.totalorder (!%p965_p8), %s1190_s30, 0 }
  0x65   : > { %850 = dma.done.wait (%p1197_p4), %s279_s19, 128  }
  0x66   : > { %852 = vsyncadd (%p1197_p4), %s279_s19, 4294967168  ;;  %p1198_p5 = scmp.eq.s32.totalorder %s946_s28, 0 }
  0x68   : > { %854 = dma.done.wait (%p1198_p5), [#allocation6], 272   ;;  %p1199_p8 = pmov %p1198_p5 }
  0x69   : > { %vm323_vm0 = vcmask 261120   ;;  %v322_v0 = vld [vmem:[%s282_s20] sm:$0xff]  ;;  %v713_v7 = vld [vmem:[#allocation5] sm:$0xff]   ;;  %v882_v8 = vmov 0.0   ;;  %v714_v9 = vld [vmem:[#allocation5 + $0x8] sm:$0xff]   ;;  %vm883_vm1 = vmmov 0  }
  0x6a   : > { %856 = vsyncadd (%p1199_p8), [#allocation6], 4294967024  ;;  %v324_v1 = vsel %vm323_vm0, %v322_v0, 0.0  ;;  %626 = vmatprep.subr.bf16.mxu0 %v882_v8  ;;  %634 = vmatprep.subr.bf16.mxu1 %v882_v8  ;;  %v606_v14 = vld [vmem:[%s1180_s1] ss:$0 sm:$0xff]  ;;  %v716_v21 = vld [vmem:[%s1184_s5 + $0x8] sm:$0xff]  }
  0x6b   : > { %325 = vadd.xlane.f32.xlu0 %v324_v1  ;;  %627 = vmatpush3.bf16.msra.mxu0 %v713_v7  ;;  %v607_v16 = vld [vmem:[%s1181_s2] ss:$0 sm:$0xff]  ;;  %s617_s19 = sshll.u32 %s946_s28, 7  ;;  %s320_s20 = scalar_lea.vmem [#allocation8], %s602_s14 }
  0x6c   : > { %630 = vmatprep.mubr.msk.bf16.mxu0 %vm883_vm1, %v882_v8  ;;  %628 = vmatprep.subr.bf16.mxu0 %v882_v8  ;;  %v715_v20 = vld [vmem:[%s1184_s5] sm:$0xff]   ;;  %s505_s30 = sshll.u32 %s320_s20, 4  ;;  %s1134_s22 = scalar_lea.hbm %s1186_s7, %s617_s19  ;;  %s1136_s30 = int_to_ptr.vmem [resolvable:$true] %s505_s30 }
  0x6d   : > { %638 = vmatprep.mubr.msk.bf16.mxu1 %vm883_vm1, %v882_v8  ;;  %635 = vmatpush3.bf16.msra.mxu1 %v715_v20  ;;  %v608_v22 = vld [vmem:[#allocation7] ss:$0 sm:$0xff]  ;;  %s492_s28 = scalar_lea.sflag [#allocation4], %s1095_s12  ;;  %s805_s14 = scalar_lea.vmem %s1136_s30, 128 }
  0x6e   : > { %636 = vmatprep.subr.bf16.mxu1 %v882_v8  ;;  %v612_v31 = vld [vmem:[%s1185_s6] ss:$0 sm:$0xff]  ;;  %p806_p11 = scmp.ne.s32.totalorder %s1136_s30, %s805_s14  ;;  %p1200_p0 = scmp.ne.s32.totalorder %s1195_s15, 0 }
  0x6f   : > { %629 = vmatpush3.bf16.msra.mxu0 %v714_v9  ;;  %s884_s23 = smov [#allocation8]  }
  0x70   : > { %p807_p1 = pnand %p806_p11, %p1200_p0  ;;  %s809_s29 = sshll.u32 %s884_s23, 4  ;;  %s810_s29 = int_to_ptr.vmem [resolvable:$false] %s809_s29 }
  0x71   : > { %637 = vmatpush3.bf16.msra.mxu1 %v716_v21  ;;  %s811_s17 = scalar_lea.vmem %s810_s29, 256  ;;  %p812_p7 = scmp.lt.s32.totalorder %s1136_s30, %s810_s29 }
  0x72   : > { %p808_p3 = pneg %p807_p1  ;;  %p813_p9 = scmp.lt.s32.totalorder %s811_s17, %s805_s14 }
  0x74   : > { %p814_p12 = por %p813_p9, %p812_p7 }
  0x76   : > { %p815_p2 = pnand %p814_p12, %p808_p3 }
  0xf8   : > { %v326_v2 = vpop.xlane.xlu0 %325 }
  0xf9   : > { %v327_v3 = vmul.f32 0.03125, %v326_v2 }
  0xfb   : > { %v328_v4 = vsub.f32 %v322_v0, %v327_v3 }
  0xfd   : > { %v329_v5 = vmul.f32 %v328_v4, %v328_v4 }
  0xff   : > { %v330_v6 = vsel %vm323_vm0, %v329_v5, 0.0 }
 0x100   : > { %331 = vadd.xlane.f32.xlu0 %v330_v6 }
 0x18d   : > { %v332_v10 = vpop.xlane.xlu0 %331 }
 0x18e   : > { %v333_v11 = vmul.f32 0.03125, %v332_v10 }
 0x190   : > { %v334_v12 = vadd.f32 1e-05, %v333_v11 }
 0x192   : > { %717 = vrsqrt.f32 %v334_v12 }
 0x19c   : > { %v718_v13 = vpop.eup %717 }
 0x19d   : > { %v336_v15 = vmul.f32 %v718_v13, %v328_v4 }
 0x19f   : > { %v344_v17 = vmul.f32 %v606_v14, %v336_v15 }
 0x1a1   : > { %v352_v18 = vadd.f32 %v607_v16, %v344_v17 }
 0x1a3   : > { %v353_v19 = vpack.c.bf16 %v352_v18, %v352_v18 }
 0x1a5   : > { %631 = vmatmul.mubr.msk.bf16.vlgmr.msra.gmra.mrb[0].mxu0 %vm323_vm0, %v353_v19 }
 0x278   : > { %v414_v23 = vpop.f32.mrb[0].mxu0 }
 0x279   : > { %v415_v24 = vadd.f32 %v608_v22, %v414_v23  ;;  %v632_v25 = vpop.f32.mrb[1].mxu0 }
 0x27a   : > { %v417_v26 = vpop.f32.mrb[2].mxu0 }
 0x27b   : > { %v420_v27 = vmul.f32 0.01, %v415_v24  ;;  %v633_v28 = vpop.f32.mrb[3].mxu0 }
 0x27d   : > { %v421_v29 = vmax.f32 %v415_v24, %v420_v27 }
 0x27f   : > { %v422_v30 = vpack.c.bf16 %v421_v29, %v421_v29 }
 0x281   : > { %639 = vmatmul.mubr.msk.bf16.vlgmr.msra.gmra.mrb[0].mxu1 %vm323_vm0, %v422_v30 }
 0x354   : > { %v483_v32 = vpop.f32.mrb[0].mxu1 }
 0x355   : > { %v484_v33 = vadd.f32 %v612_v31, %v483_v32  ;;  %v640_v34 = vpop.f32.mrb[1].mxu1 }
 0x356   : > { %v486_v35 = vpop.f32.mrb[2].mxu1 }
 0x357   : > { %v489_v36 = vadd.f32 %v484_v33, %v322_v0  ;;  %v641_v37 = vpop.f32.mrb[3].mxu1 }
 0x359   : > { %490 = vst.msk [vmem:[%s320_s20] sm:$0xff] %vm323_vm0, %v489_v36 }
 0x35a   : > { %818 = shalt.err (!%p815_p2)
}
 0x35b   : > { %s819_s12 = scalar_lea.hbm %s1134_s22, 128  ;;  %s823_s18 = scalar_lea.hbm %s1186_s7, 256 }
 0x35c   : > { %p820_p13 = scmp.ne.s32.totalorder %s1134_s22, %s819_s12  ;;  %p824_p4 = scmp.lt.u32.totalorder %s1134_s22, %s1186_s7 }
 0x35d   : > { %p825_p5 = scmp.lt.u32.totalorder %s823_s18, %s819_s12  ;;  %p827_p11 = scmp.lt.u32.totalorder %s819_s12, %s1134_s22 }
 0x35e   : > { %p821_p6 = pnand %p820_p13, %p1200_p0 }
 0x35f   : > { %p826_p8 = por %p825_p5, %p824_p4 }
 0x360   : > { %p822_p10 = pneg %p821_p6 }
 0x361   : > { %p828_p1 = por %p827_p11, %p826_p8 }
 0x363   : > { %p829_p3 = pnand %p828_p1, %p822_p10 }
 0x365   : > { %832 = shalt.err (!%p829_p3)
}
 0x366   : > { %652 = dma.vmem_to_hbm [thread:$0]  (%p1200_p0), %s1136_s30, 128, %s1134_s22, %s492_s28  }
 0x367 PF: > { %s517_s9 = sand.u32 1, %s863_s24   ;;  %p1201_p7 = scmp.ne.s32.totalorder %s1191_s8, 0 }
 0x368   : > { %p1202_p9 = scmp.ge.s32.totalorder %s875_s27, 2  ;;  %s518_s21 = scalar_lea.sflag [#allocation4], %s517_s9 }
 0x36a   : > { %p666_p12 = pnand %p1202_p9, %p1201_p7 }
 0x36c   : > { %858 = dma.done.wait (!%p666_p12), %s518_s21, 128  }
 0x36d   : > { %860 = vsyncadd (!%p666_p12), %s518_s21, 4294967168  ;;  %p21_p2 = scmp.ge.s32.totalorder %s1036_s10, 4   ;;  %s1203_s24 = smov %s867_s25 }
 0x36e   : > { %s1204_s25 = smov %s871_s26  ;;  %s1205_s26 = smov %s1052_s16 }
 0x36f   : > { %s1206_s27 = smov %s1036_s10  ;;  %23 = sbr.rel (!%p21_p2) target bundleno = 6 (0x6), region = 101 }
 0x376   :  { %523 = vsyncpa [#allocation3], 1 }
 0x377   :  { %525 = vsyncpa [#allocation3 + $0x1], 1 }
 0x378   :  { %526 = vsyncpa [#allocation6], 1 }
 0x379   :  { %527 = vsyncpa [#allocation4], 1 }
 0x37a   :  { %529 = vsyncpa [#allocation4 + $0x1], 1 }

// kernel: tpu_custom_call.1
= control target key start
LH: loop header
LB: loop body
LE: loop exit
PB: predicated region body
PF: predicated region fallthrough
CT: control target
= control target key end

     0   :  { %12 = vsyncpa [#allocation3], 0  ;;  %s1179_s0 = inlined_call_operand.hbm [shape: f32[16,32], index: 0, kind: input, shape index: {}]   ;;  %s1180_s1 = inlined_call_operand.vmem [shape: f32[1,32], index: 1, kind: input, shape index: {}]   ;;  %s1181_s2 = inlined_call_operand.vmem [shape: f32[1,32], index: 2, kind: input, shape index: {}]   ;;  %s1182_s3 = inlined_call_operand.hbm [shape: bf16[32,32], index: 3, kind: input, shape index: {}]   ;;  %s1183_s4 = inlined_call_operand.hbm [shape: f32[1,32], index: 4, kind: input, shape index: {}]   ;;  %s1184_s5 = inlined_call_operand.vmem [shape: bf16[32,32], index: 5, kind: input, shape index: {}]   ;;  %s1185_s6 = inlined_call_operand.vmem [shape: f32[1,32], index: 6, kind: input, shape index: {}]   ;;  %s1186_s7 = inlined_call_operand.hbm [shape: f32[16,32], index: 7, kind: output, shape index: {}]  }
   0x1   :  { %14 = vsyncpa [#allocation3 + $0x1], 0 }
   0x2   :  { %15 = vsyncpa [#allocation6], 0 }
   0x3   :  { %16 = vsyncpa [#allocation4], 0 }
   0x4   :  { %18 = vsyncpa [#allocation4 + $0x1], 0  ;;  %s925_s24 = smov 0   ;;  %s927_s25 = smov 0  }
   0x5   :  { %s929_s26 = smov 0   ;;  %s931_s27 = smov 0  }
   0x6 LB: > { %s946_s28 = sadd.s32 4294967295, %s875_s27   ;;  %s594_s29 = sadd.s32 4294967294, %s875_s27   ;;  %s875_s27 = sphi %s931_s27, %s1206_s27   ;;  %s871_s26 = sphi %s929_s26, %s1205_s26   ;;  %s867_s25 = sphi %s927_s25, %s1204_s25   ;;  %s863_s24 = sphi %s925_s24, %s1203_s24  }
   0x7   : > { %p44_p0 = scmp.ne.s32.totalorder %s867_s25, %s863_s24  ;;  %p1187_p1 = scmp.eq.s32.totalorder %s946_s28, 0 }
   0x8   : > { %p200_p3 = scmp.eq.s32.totalorder %s594_s29, 1  ;;  %p595_p5 = scmp.ge.s32.totalorder %s875_s27, 1 }
   0x9   : > { %p955_p4 = por %p1187_p1, %p44_p0  ;;  %p207_p7 = scmp.lt.s32.totalorder %s875_s27, 3 }
   0xa   : > { %p960_p6 = por %p200_p3, %p44_p0  ;;  %s877_s10 = smov [#allocation5]  }
   0xb   : > { %s1190_s30 = scalar_select %p955_p4, 1, 0 }
   0xc   : > { %s1191_s8 = scalar_select %p960_p6, 1, 0 }
   0xd   : > { %p965_p8 = pnand %p595_p5, %p207_p7  ;;  %s225_s11 = sshll.u32 %s877_s10, 4  ;;  %s969_s11 = int_to_ptr.vmem [resolvable:$true] %s225_s11 }
   0xe   : > { %s878_s13 = smov [#allocation7]   ;;  %s719_s17 = scalar_lea.hbm %s1182_s3, 256 }
   0xf   : > { %p654_p9 = pneg %p965_p8  ;;  %s239_s14 = sshll.u32 %s878_s13, 4  ;;  %s980_s14 = int_to_ptr.vmem [resolvable:$true] %s239_s14 }
  0x10   : > { %p720_p12 = scmp.ne.s32.totalorder %s1182_s3, %s719_s17  ;;  %p726_p5 = scmp.lt.u32.totalorder %s719_s17, %s1182_s3 }
  0x11   : > { %p976_p11 = pnand %p654_p9, %p1187_p1 }
  0x13   : > { %p721_p13 = pneg %p976_p11 }
  0x15   : > { %p722_p0 = pnand %p721_p13, %p720_p12 }
  0x17   : > { %p723_p3 = pneg %p722_p0 }
  0x19   : > { %p728_p7 = pnand %p726_p5, %p723_p3 }
  0x1b   : > { %731 = shalt.err (!%p728_p7)
}
  0x1c   : > { %s732_s22 = scalar_lea.vmem %s969_s11, 256  ;;  %p740_p2 = scmp.lt.s32.totalorder %s969_s11, %s969_s11 }
  0x1d   : > { %p733_p9 = scmp.ne.s32.totalorder %s969_s11, %s732_s22  ;;  %p741_p12 = scmp.lt.s32.totalorder %s732_s22, %s732_s22 }
  0x1f   : > { %p735_p10 = pnand %p733_p9, %p721_p13  ;;  %p742_p0 = por %p741_p12, %p740_p2 }
  0x21   : > { %p736_p1 = pneg %p735_p10 }
  0x23   : > { %p743_p6 = pnand %p742_p0, %p736_p1 }
  0x25   : > { %746 = shalt.err (!%p743_p6)
}
  0x26   : > { %s879_s23 = smov 64   ;;  %s880_s29 = smov 4  }
  0x27   : > { %657 = dma.hbm_to_vmem [thread:$0]  (!%p976_p11), %s1182_s3, 256, %s969_s11, [#allocation6], %s879_s23, %s879_s23, %s880_s29  }
  0x28   : > { %s747_s17 = scalar_lea.hbm %s1183_s4, 16 }
  0x29   : > { %p748_p2 = scmp.ne.s32.totalorder %s1183_s4, %s747_s17  ;;  %p754_p10 = scmp.lt.u32.totalorder %s747_s17, %s1183_s4 }
  0x2b   : > { %p750_p1 = pnand %p748_p2, %p721_p13 }
  0x2d   : > { %p751_p6 = pneg %p750_p1 }
  0x2f   : > { %p756_p3 = pnand %p754_p10, %p751_p6 }
  0x31   : > { %759 = shalt.err (!%p756_p3)
}
  0x32   : > { %s760_s11 = scalar_lea.vmem %s980_s14, 16  ;;  %s767_s22 = scalar_lea.vmem %s980_s14, 32 }
  0x33   : > { %p761_p5 = scmp.ne.s32.totalorder %s980_s14, %s760_s11  ;;  %p768_p12 = scmp.lt.s32.totalorder %s980_s14, %s980_s14 }
  0x34   : > { %p769_p0 = scmp.lt.s32.totalorder %s767_s22, %s760_s11 }
  0x35   : > { %p763_p7 = pnand %p761_p5, %p721_p13 }
  0x36   : > { %p770_p2 = por %p769_p0, %p768_p12 }
  0x37   : > { %p764_p9 = pneg %p763_p7 }
  0x39   : > { %p771_p1 = pnand %p770_p2, %p764_p9 }
  0x3b   : > { %774 = shalt.err (!%p771_p1)
}
  0x3c   : > { %660 = dma.hbm_to_vmem [thread:$0]  (!%p976_p11), %s1183_s4, 16, %s980_s14, [#allocation6]  }
  0x3d   : > { %s1036_s10 = sadd.s32 1, %s875_s27   ;;  %s31_s12 = sadd.s32 1, %s871_s26 }
  0x3e   : > { %s28_s13 = ssub.s32 %s875_s27, %s1036_s10  ;;  %p38_p13 = scmp.ne.s32.totalorder %s871_s26, %s867_s25 }
  0x3f   : > { %p29_p6 = scmp.eq.s32.totalorder %s28_s13, 0  ;;  %p39_p10 = scmp.eq.s32.totalorder %s875_s27, 0 }
  0x40   : > { %p1194_p3 = scmp.eq.s32.totalorder %s946_s28, 1  ;;  %p671_p7 = scmp.lt.s32.totalorder %s875_s27, 2 }
  0x41   : > { %s1052_s16 = scalar_select %p29_p6, %s871_s26, %s31_s12  }
  0x42   : > { %p1046_p5 = por %p1194_p3, %p38_p13  ;;  %p40_p9 = por %p39_p10, %p38_p13 }
  0x43   : > { %s256_s17 = sand.u32 1, %s871_s26   ;;  %s600_s14 = sshll.u32 %s875_s27, 7 }
  0x44   : > { %s1195_s15 = scalar_select %p1046_p5, 1, 0 }
  0x45   : > { %s599_s18 = sshll.u32 %s256_s17, 3  ;;  %s1059_s21 = scalar_lea.hbm %s1179_s0, %s600_s14 }
  0x46   : > { %s260_s11 = scalar_lea.vmem [#allocation2], %s599_s18  ;;  %p1063_p11 = pnand %p671_p7, %p40_p9 }
  0x47   : > { %s267_s22 = sshll.u32 %s260_s11, 4  ;;  %s257_s29 = scalar_lea.sflag [#allocation3], %s256_s17  ;;  %s1061_s22 = int_to_ptr.vmem [resolvable:$true] %s267_s22 }
  0x48   : > { %s775_s12 = scalar_lea.hbm %s1059_s21, 128  ;;  %p777_p0 = pneg %p1063_p11 }
  0x49   : > { %p776_p12 = scmp.ne.s32.totalorder %s1059_s21, %s775_s12  ;;  %s780_s14 = scalar_lea.hbm %s1179_s0, 256 }
  0x4a   : > { %p781_p13 = scmp.lt.u32.totalorder %s1059_s21, %s1179_s0  ;;  %p782_p6 = scmp.lt.u32.totalorder %s780_s14, %s775_s12 }
  0x4b   : > { %p778_p2 = pnand %p777_p0, %p776_p12  ;;  %p784_p3 = scmp.lt.u32.totalorder %s775_s12, %s1059_s21 }
  0x4c   : > { %p783_p10 = por %p782_p6, %p781_p13 }
  0x4d   : > { %p779_p1 = pneg %p778_p2 }
  0x4e   : > { %p785_p7 = por %p784_p3, %p783_p10 }
  0x50   : > { %p786_p9 = pnand %p785_p7, %p779_p1 }
  0x52   : > { %789 = shalt.err (!%p786_p9)
}
  0x53   : > { %s790_s17 = scalar_lea.vmem %s1061_s22, 128  ;;  %s881_s11 = smov [#allocation2]  }
  0x54   : > { %p791_p12 = scmp.ne.s32.totalorder %s1061_s22, %s790_s17  ;;  %s795_s13 = sshll.u32 %s881_s11, 4  ;;  %s796_s13 = int_to_ptr.vmem [resolvable:$false] %s795_s13 }
  0x55   : > { %s797_s18 = scalar_lea.vmem %s796_s13, 256  ;;  %p798_p4 = scmp.lt.s32.totalorder %s1061_s22, %s796_s13 }
  0x56   : > { %p793_p2 = pnand %p791_p12, %p777_p0  ;;  %p799_p13 = scmp.lt.s32.totalorder %s797_s18, %s790_s17 }
  0x58   : > { %p794_p5 = pneg %p793_p2  ;;  %p800_p6 = por %p799_p13, %p798_p4 }
  0x5a   : > { %p801_p10 = pnand %p800_p6, %p794_p5 }
  0x5c   : > { %804 = shalt.err (!%p801_p10)
}
  0x5d   : > { %664 = dma.hbm_to_vmem [thread:$0]  (!%p1063_p11), %s1059_s21, 128, %s1061_s22, %s257_s29  }
  0x5e   : > { %276 = sbr.rel (%p965_p8) target bundleno = 871 (0x367), region = 48  ;;  %s1095_s12 = sand.u32 (!%p965_p8), 1, %s867_s25  }
  0x5f   : > { %s602_s14 = sshll.u32 (!%p965_p8), %s1095_s12, 3  ;;  %s279_s19 = scalar_lea.sflag (!%p965_p8), [#allocation3], %s1095_s12 }
  0x60   : > { %s282_s20 = scalar_lea.vmem (!%p965_p8), [#allocation2], %s602_s14  ;;  %p1197_p4 = scmp.ne.s32.totalorder (!%p965_p8), %s1190_s30, 0 }
  0x65   : > { %850 = dma.done.wait (%p1197_p4), %s279_s19, 128  }
  0x66   : > { %852 = vsyncadd (%p1197_p4), %s279_s19, 4294967168  ;;  %p1198_p5 = scmp.eq.s32.totalorder %s946_s28, 0 }
  0x68   : > { %854 = dma.done.wait (%p1198_p5), [#allocation6], 272   ;;  %p1199_p8 = pmov %p1198_p5 }
  0x69   : > { %vm323_vm0 = vcmask 261120   ;;  %v322_v0 = vld [vmem:[%s282_s20] sm:$0xff]  ;;  %v713_v7 = vld [vmem:[#allocation5] sm:$0xff]   ;;  %v882_v8 = vmov 0.0   ;;  %v714_v9 = vld [vmem:[#allocation5 + $0x8] sm:$0xff]   ;;  %vm883_vm1 = vmmov 0  }
  0x6a   : > { %856 = vsyncadd (%p1199_p8), [#allocation6], 4294967024  ;;  %v324_v1 = vsel %vm323_vm0, %v322_v0, 0.0  ;;  %626 = vmatprep.subr.bf16.mxu0 %v882_v8  ;;  %634 = vmatprep.subr.bf16.mxu1 %v882_v8  ;;  %v606_v14 = vld [vmem:[%s1180_s1] ss:$0 sm:$0xff]  ;;  %v716_v21 = vld [vmem:[%s1184_s5 + $0x8] sm:$0xff]  }
  0x6b   : > { %325 = vadd.xlane.f32.xlu0 %v324_v1  ;;  %627 = vmatpush3.bf16.msra.mxu0 %v713_v7  ;;  %v607_v16 = vld [vmem:[%s1181_s2] ss:$0 sm:$0xff]  ;;  %s617_s19 = sshll.u32 %s946_s28, 7  ;;  %s320_s20 = scalar_lea.vmem [#allocation8], %s602_s14 }
  0x6c   : > { %630 = vmatprep.mubr.msk.bf16.mxu0 %vm883_vm1, %v882_v8  ;;  %628 = vmatprep.subr.bf16.mxu0 %v882_v8  ;;  %v715_v20 = vld [vmem:[%s1184_s5] sm:$0xff]   ;;  %s505_s30 = sshll.u32 %s320_s20, 4  ;;  %s1134_s22 = scalar_lea.hbm %s1186_s7, %s617_s19  ;;  %s1136_s30 = int_to_ptr.vmem [resolvable:$true] %s505_s30 }
  0x6d   : > { %638 = vmatprep.mubr.msk.bf16.mxu1 %vm883_vm1, %v882_v8  ;;  %635 = vmatpush3.bf16.msra.mxu1 %v715_v20  ;;  %v608_v22 = vld [vmem:[#allocation7] ss:$0 sm:$0xff]  ;;  %s492_s28 = scalar_lea.sflag [#allocation4], %s1095_s12  ;;  %s805_s14 = scalar_lea.vmem %s1136_s30, 128 }
  0x6e   : > { %636 = vmatprep.subr.bf16.mxu1 %v882_v8  ;;  %v612_v31 = vld [vmem:[%s1185_s6] ss:$0 sm:$0xff]  ;;  %p806_p11 = scmp.ne.s32.totalorder %s1136_s30, %s805_s14  ;;  %p1200_p0 = scmp.ne.s32.totalorder %s1195_s15, 0 }
  0x6f   : > { %629 = vmatpush3.bf16.msra.mxu0 %v714_v9  ;;  %s884_s23 = smov [#allocation8]  }
  0x70   : > { %p807_p1 = pnand %p806_p11, %p1200_p0  ;;  %s809_s29 = sshll.u32 %s884_s23, 4  ;;  %s810_s29 = int_to_ptr.vmem [resolvable:$false] %s809_s29 }
  0x71   : > { %637 = vmatpush3.bf16.msra.mxu1 %v716_v21  ;;  %s811_s17 = scalar_lea.vmem %s810_s29, 256  ;;  %p812_p7 = scmp.lt.s32.totalorder %s1136_s30, %s810_s29 }
  0x72   : > { %p808_p3 = pneg %p807_p1  ;;  %p813_p9 = scmp.lt.s32.totalorder %s811_s17, %s805_s14 }
  0x74   : > { %p814_p12 = por %p813_p9, %p812_p7 }
  0x76   : > { %p815_p2 = pnand %p814_p12, %p808_p3 }
  0xf8   : > { %v326_v2 = vpop.xlane.xlu0 %325 }
  0xf9   : > { %v327_v3 = vmul.f32 0.03125, %v326_v2 }
  0xfb   : > { %v328_v4 = vsub.f32 %v322_v0, %v327_v3 }
  0xfd   : > { %v329_v5 = vmul.f32 %v328_v4, %v328_v4 }
  0xff   : > { %v330_v6 = vsel %vm323_vm0, %v329_v5, 0.0 }
 0x100   : > { %331 = vadd.xlane.f32.xlu0 %v330_v6 }
 0x18d   : > { %v332_v10 = vpop.xlane.xlu0 %331 }
 0x18e   : > { %v333_v11 = vmul.f32 0.03125, %v332_v10 }
 0x190   : > { %v334_v12 = vadd.f32 1e-05, %v333_v11 }
 0x192   : > { %717 = vrsqrt.f32 %v334_v12 }
 0x19c   : > { %v718_v13 = vpop.eup %717 }
 0x19d   : > { %v336_v15 = vmul.f32 %v718_v13, %v328_v4 }
 0x19f   : > { %v344_v17 = vmul.f32 %v606_v14, %v336_v15 }
 0x1a1   : > { %v352_v18 = vadd.f32 %v607_v16, %v344_v17 }
 0x1a3   : > { %v353_v19 = vpack.c.bf16 %v352_v18, %v352_v18 }
 0x1a5   : > { %631 = vmatmul.mubr.msk.bf16.vlgmr.msra.gmra.mrb[0].mxu0 %vm323_vm0, %v353_v19 }
 0x278   : > { %v414_v23 = vpop.f32.mrb[0].mxu0 }
 0x279   : > { %v415_v24 = vadd.f32 %v608_v22, %v414_v23  ;;  %v632_v25 = vpop.f32.mrb[1].mxu0 }
 0x27a   : > { %v417_v26 = vpop.f32.mrb[2].mxu0 }
 0x27b   : > { %v420_v27 = vmul.f32 0.01, %v415_v24  ;;  %v633_v28 = vpop.f32.mrb[3].mxu0 }
 0x27d   : > { %v421_v29 = vmax.f32 %v415_v24, %v420_v27 }
 0x27f   : > { %v422_v30 = vpack.c.bf16 %v421_v29, %v421_v29 }
 0x281   : > { %639 = vmatmul.mubr.msk.bf16.vlgmr.msra.gmra.mrb[0].mxu1 %vm323_vm0, %v422_v30 }
 0x354   : > { %v483_v32 = vpop.f32.mrb[0].mxu1 }
 0x355   : > { %v484_v33 = vadd.f32 %v612_v31, %v483_v32  ;;  %v640_v34 = vpop.f32.mrb[1].mxu1 }
 0x356   : > { %v486_v35 = vpop.f32.mrb[2].mxu1 }
 0x357   : > { %v489_v36 = vadd.f32 %v484_v33, %v322_v0  ;;  %v641_v37 = vpop.f32.mrb[3].mxu1 }
 0x359   : > { %490 = vst.msk [vmem:[%s320_s20] sm:$0xff] %vm323_vm0, %v489_v36 }
 0x35a   : > { %818 = shalt.err (!%p815_p2)
}
 0x35b   : > { %s819_s12 = scalar_lea.hbm %s1134_s22, 128  ;;  %s823_s18 = scalar_lea.hbm %s1186_s7, 256 }
 0x35c   : > { %p820_p13 = scmp.ne.s32.totalorder %s1134_s22, %s819_s12  ;;  %p824_p4 = scmp.lt.u32.totalorder %s1134_s22, %s1186_s7 }
 0x35d   : > { %p825_p5 = scmp.lt.u32.totalorder %s823_s18, %s819_s12  ;;  %p827_p11 = scmp.lt.u32.totalorder %s819_s12, %s1134_s22 }
 0x35e   : > { %p821_p6 = pnand %p820_p13, %p1200_p0 }
 0x35f   : > { %p826_p8 = por %p825_p5, %p824_p4 }
 0x360   : > { %p822_p10 = pneg %p821_p6 }
 0x361   : > { %p828_p1 = por %p827_p11, %p826_p8 }
 0x363   : > { %p829_p3 = pnand %p828_p1, %p822_p10 }
 0x365   : > { %832 = shalt.err (!%p829_p3)
}
 0x366   : > { %652 = dma.vmem_to_hbm [thread:$0]  (%p1200_p0), %s1136_s30, 128, %s1134_s22, %s492_s28  }
 0x367 PF: > { %s517_s9 = sand.u32 1, %s863_s24   ;;  %p1201_p7 = scmp.ne.s32.totalorder %s1191_s8, 0 }
 0x368   : > { %p1202_p9 = scmp.ge.s32.totalorder %s875_s27, 2  ;;  %s518_s21 = scalar_lea.sflag [#allocation4], %s517_s9 }
 0x36a   : > { %p666_p12 = pnand %p1202_p9, %p1201_p7 }
 0x36c   : > { %858 = dma.done.wait (!%p666_p12), %s518_s21, 128  }
 0x36d   : > { %860 = vsyncadd (!%p666_p12), %s518_s21, 4294967168  ;;  %p21_p2 = scmp.ge.s32.totalorder %s1036_s10, 4   ;;  %s1203_s24 = smov %s867_s25 }
 0x36e   : > { %s1204_s25 = smov %s871_s26  ;;  %s1205_s26 = smov %s1052_s16 }
 0x36f   : > { %s1206_s27 = smov %s1036_s10  ;;  %23 = sbr.rel (!%p21_p2) target bundleno = 6 (0x6), region = 101 }
 0x376   :  { %523 = vsyncpa [#allocation3], 1 }
 0x377   :  { %525 = vsyncpa [#allocation3 + $0x1], 1 }
 0x378   :  { %526 = vsyncpa [#allocation6], 1 }
 0x379   :  { %527 = vsyncpa [#allocation4], 1 }
 0x37a   :  { %529 = vsyncpa [#allocation4 + $0x1], 1 }

</bundles_post_ra>
